<compile_context>
chip_gen: v6e
topology: v6e:2x2x1
jax: 0.10.0
libtpu: 0.0.40
codegen_flags: <defaults>
</compile_context>

<pallas_src>
import functools

import jax
import jax.numpy as jnp
from jax.experimental import pallas as pl
from jax.experimental.pallas import tpu as pltpu


def _round_up(v, m):
    return (v + m - 1) // m * m


def _min_sublane(dtype):
    # f32 -> 8, bf16 -> 16, int8/fp8 -> 32 rows of sublane granularity.
    return {4: 8, 2: 16, 1: 32}.get(jnp.dtype(dtype).itemsize, 8)


def _tpu_vmem_capacity():
    """Per-core VMEM capacity in bytes (generation-aware; conservative fallback)."""
    try:
        info = pltpu.get_tpu_info()
        cap = int(getattr(info, "vmem_capacity_bytes", 0) or 0)
        if cap > 0:
            return cap
    except Exception:
        pass  # hardware query unavailable -> assume the smallest (v7x: 64 MiB)
    return 64 << 20


# ----------------------------- kernels ---------------------------------------

def _ffn_kernel_resident(x_ref, w1_ref, b1_ref, w2_ref, b2_ref, o_ref):
    # Whole (padded) W1/W2/biases are VMEM-resident; grid = (row tiles,).
    # Weight index_maps are constant -> DMA'd from HBM exactly once.
    x = x_ref[...]
    h = jnp.dot(x, w1_ref[...], preferred_element_type=jnp.float32)
    h = jnp.maximum(h + b1_ref[...].astype(jnp.float32), 0.0)
    # TODO(synk): training-mode dropout (pltpu.prng_* mask) omitted; eval identity.
    h = h.astype(x.dtype)  # numerics contract: bf16 MXU path for the 2nd GEMM
    out = jnp.dot(h, w2_ref[...], preferred_element_type=jnp.float32)
    o_ref[...] = (out + b2_ref[...].astype(jnp.float32)).astype(o_ref.dtype)


def _ffn_kernel_streamed(x_ref, w1_ref, b1_ref, w2_ref, b2_ref, o_ref, acc_ref):
    # d_ff streamed in chunks; grid = (row tiles, d_ff chunks).
    # The f32 accumulator is initialized with b2, so there is no epilogue add.
    k = pl.program_id(1)

    @pl.when(k == 0)
    def _():
        acc_ref[...] = jnp.broadcast_to(
            b2_ref[...].astype(jnp.float32), acc_ref.shape)

    x = x_ref[...]
    h = jnp.dot(x, w1_ref[...], preferred_element_type=jnp.float32)
    h = jnp.maximum(h + b1_ref[...].astype(jnp.float32), 0.0)
    # TODO(synk): training-mode dropout omitted (eval identity).
    h = h.astype(x.dtype)
    acc_ref[...] += jnp.dot(h, w2_ref[...], preferred_element_type=jnp.float32)

    @pl.when(k == pl.num_programs(1) - 1)
    def _():
        o_ref[...] = acc_ref[...].astype(o_ref.dtype)


# ----------------------------- planning --------------------------------------

def _plan_ffn(x_shape, dtype, d_ff, *, tm, ff_chunk):
    """Pure-Python, static planning of tile sizes / residency / VMEM limit."""
    B, S, d_model = x_shape
    M = B * S
    itemsize = jnp.dtype(dtype).itemsize
    sub = _min_sublane(dtype)

    dm_pad = _round_up(d_model, 128)
    df_full = _round_up(d_ff, 128)

    vmem_cap = _tpu_vmem_capacity()
    vmem_budget = int(vmem_cap * 0.8)

    # ---- resident-weights decision ------------------------------------------
    # Constant-index blocks are DMA'd once but still double-buffered by the
    # pipeliner; account 2 buffers per operand when checking the fit.
    resident_bytes = (2 * 2 * dm_pad * df_full * itemsize          # W1 + W2
                      + 2 * 8 * (df_full + dm_pad) * itemsize)     # b1 + b2
    resident = (ff_chunk is None) and (resident_bytes <= vmem_budget // 3)

    if resident:
        tf = df_full
    else:
        req = int(ff_chunk) if ff_chunk is not None else 512
        # 256-aligned chunks keep v6e/v7x's 256x256 MXU passes full (256 is also
        # a multiple of v5e's 128 tile).
        tf = min(_round_up(req, 256), df_full)
    df_pad = _round_up(df_full, tf)

    # ---- row-tile size --------------------------------------------------------
    if tm is None:
        if resident:
            tm_target = 256
        else:
            # Streamed weights: big row tiles keep the kernel above the
            # weight-DMA roofline (v6e needs ~1024, v7x ~512 given its HBM BW).
            tm_target = 512 if vmem_cap <= (64 << 20) else 1024
    else:
        tm_target = int(tm)

    m_ceil = _round_up(M, sub)
    tm_eff = max(min(_round_up(tm_target, sub), m_ceil), sub)

    # Keep >= 2 row tiles so the "parallel" axis still splits across 2 TCs (v7x).
    if m_ceil >= 2 * sub:
        while tm_eff > sub and _round_up(M, tm_eff) // tm_eff < 2:
            tm_eff = max(_round_up(tm_eff // 2, sub), sub)

    def _footprint(tm_):
        io = 4 * tm_ * dm_pad * itemsize                      # x + out, 2 bufs each
        if resident:
            w = 2 * 2 * dm_pad * df_pad * itemsize            # W1 + W2 (2 bufs)
            h = tm_ * df_pad * 4                              # f32 intermediate
            acc = 0
        else:
            w = 2 * 2 * dm_pad * tf * itemsize                # W1/W2 chunks (2 bufs)
            h = tm_ * tf * 4
            acc = tm_ * dm_pad * 4                            # f32 accumulator
        bias = 2 * 8 * (tf + dm_pad) * itemsize
        return io + w + h + acc + bias

    while tm_eff > sub and _footprint(tm_eff) > vmem_budget:
        tm_eff = max(_round_up(tm_eff // 2, sub), sub)

    m_pad = _round_up(M, tm_eff)
    vmem_limit = int(min(max(_footprint(tm_eff) * 3 // 2, 32 << 20),
                         int(vmem_cap * 0.85)))
    vmem_limit = max(vmem_limit, int(_footprint(tm_eff)))

    return dict(tm_eff=int(tm_eff), tf=int(tf), dm_pad=int(dm_pad),
                df_pad=int(df_pad), m_pad=int(m_pad),
                resident=bool(resident), vmem_limit=int(vmem_limit))


# ----------------------------- pallas_call wrapper ----------------------------

@functools.partial(jax.jit, static_argnames=(
    "tm_eff", "tf", "dm_pad", "df_pad", "m_pad", "resident", "vmem_limit"))
def _ffn_impl(x, w1, b1, w2, b2, *, tm_eff, tf, dm_pad, df_pad, m_pad,
              resident, vmem_limit):
    B, S, d_model = x.shape
    d_ff = w1.shape[1]
    M = B * S
    itemsize = jnp.dtype(x.dtype).itemsize

    # Lane/sublane-friendly padding -> lane-dense, unmasked stores.
    x2d = jnp.pad(x.reshape(M, d_model), ((0, m_pad - M), (0, dm_pad - d_model)))
    w1p = jnp.pad(w1, ((0, dm_pad - d_model), (0, df_pad - d_ff)))
    b1p = jnp.pad(b1, (0, df_pad - d_ff)).reshape(1, df_pad)
    w2p = jnp.pad(w2, ((0, df_pad - d_ff), (0, dm_pad - d_model)))
    b2p = jnp.pad(b2, (0, dm_pad - d_model)).reshape(1, dm_pad)

    num_i = m_pad // tm_eff
    weight_reads = 1 if resident else num_i   # honest DMA traffic estimate
    cost = pl.CostEstimate(
        flops=4 * m_pad * dm_pad * df_pad,    # two GEMMs
        transcendentals=0,
        bytes_accessed=(2 * m_pad * dm_pad * itemsize
                        + weight_reads * 2 * dm_pad * df_pad * itemsize
                        + (df_pad + dm_pad) * itemsize),
    )

    if resident:
        grid = (num_i,)
        in_specs = [
            pl.BlockSpec((tm_eff, dm_pad), lambda i: (i, 0)),   # x tile
            pl.BlockSpec((dm_pad, df_pad), lambda i: (0, 0)),   # W1 (resident)
            pl.BlockSpec((1, df_pad), lambda i: (0, 0)),        # b1 (resident)
            pl.BlockSpec((df_pad, dm_pad), lambda i: (0, 0)),   # W2 (resident)
            pl.BlockSpec((1, dm_pad), lambda i: (0, 0)),        # b2 (resident)
        ]
        out_specs = pl.BlockSpec((tm_eff, dm_pad), lambda i: (i, 0))
        kernel = _ffn_kernel_resident
        scratch_shapes = []
        dim_sem = ("parallel",)
    else:
        grid = (num_i, df_pad // tf)
        in_specs = [
            pl.BlockSpec((tm_eff, dm_pad), lambda i, k: (i, 0)),  # x tile
            pl.BlockSpec((dm_pad, tf), lambda i, k: (0, k)),      # W1 chunk
            pl.BlockSpec((1, tf), lambda i, k: (0, k)),           # b1 chunk
            pl.BlockSpec((tf, dm_pad), lambda i, k: (k, 0)),      # W2 chunk
            pl.BlockSpec((1, dm_pad), lambda i, k: (0, 0)),       # b2
        ]
        out_specs = pl.BlockSpec((tm_eff, dm_pad), lambda i, k: (i, 0))
        kernel = _ffn_kernel_streamed
        scratch_shapes = [pltpu.VMEM((tm_eff, dm_pad), jnp.float32)]
        dim_sem = ("parallel", "arbitrary")

    out2d = pl.pallas_call(
        kernel,
        out_shape=jax.ShapeDtypeStruct((m_pad, dm_pad), x.dtype),
        grid_spec=pltpu.PrefetchScalarGridSpec(
            num_scalar_prefetch=0,
            grid=grid,
            in_specs=in_specs,
            out_specs=out_specs,
            scratch_shapes=scratch_shapes),
        compiler_params=pltpu.CompilerParams(
            dimension_semantics=dim_sem,
            vmem_limit_bytes=vmem_limit),
        cost_estimate=cost,
    )(x2d, w1p, b1p, w2p, b2p)

    return out2d[:M, :d_model].reshape(B, S, d_model)


def positionwise_ffn(x, w1, b1, w2, b2, *, tm=None, ff_chunk=None):
    """Eval-mode FFN: relu(x @ W1 + b1) @ W2 + b2 (dropout == identity).

    x: [B, S, d_model]; w1: [d_model, d_ff]; w2: [d_ff, d_model]
    (weights pre-transposed to (in, out), matching nn.Linear's y = x @ W.T + b).
    tm / ff_chunk default to None -> auto-planned per TPU generation; passing
    ff_chunk explicitly forces the d_ff streaming path.
    """
    cfg = _plan_ffn(x.shape, x.dtype, w1.shape[1], tm=tm, ff_chunk=ff_chunk)
    return _ffn_impl(x, w1, b1, w2, b2, **cfg)


if __name__ == "__main__":
    key = jax.random.PRNGKey(0)

    def make_params(k, d_model, d_ff, dtype):
        kw1, kb1, kw2, kb2 = jax.random.split(k, 4)
        w1 = (jax.random.normal(kw1, (d_model, d_ff)) * 0.05).astype(dtype)
        b1 = (jax.random.normal(kb1, (d_ff,)) * 0.01).astype(dtype)
        w2 = (jax.random.normal(kw2, (d_ff, d_model)) * 0.05).astype(dtype)
        b2 = (jax.random.normal(kb2, (d_model,)) * 0.01).astype(dtype)
        return w1, b1, w2, b2

    def reference(x, w1, b1, w2, b2):
        xf, w1f, b1f, w2f, b2f = (a.astype(jnp.float32) for a in (x, w1, b1, w2, b2))
        return jnp.maximum(xf @ w1f + b1f, 0.0) @ w2f + b2f

    # --- Test 1: small unaligned shapes (padding path), f32, resident weights ---
    B, S, d_model, d_ff = 2, 8, 32, 64
    k1, k2, key = jax.random.split(key, 3)
    x = jax.random.normal(k1, (B, S, d_model), dtype=jnp.float32)
    w1, b1, w2, b2 = make_params(k2, d_model, d_ff, jnp.float32)
    out = jax.block_until_ready(positionwise_ffn(x, w1, b1, w2, b2))
    ref = reference(x, w1, b1, w2, b2)
    assert out.shape == (B, S, d_model)
    assert jnp.allclose(out, ref, atol=1e-5, rtol=1e-5)

    # --- Test 2: bf16, forced d_ff streaming over 2 chunks (accumulator path) ---
    B, S, d_model, d_ff = 2, 128, 128, 512
    k1, k2, key = jax.random.split(key, 3)
    x = jax.random.normal(k1, (B, S, d_model)).astype(jnp.bfloat16)
    w1, b1, w2, b2 = make_params(k2, d_model, d_ff, jnp.bfloat16)
    out = jax.block_until_ready(positionwise_ffn(x, w1, b1, w2, b2, ff_chunk=256))
    ref = reference(x, w1, b1, w2, b2)
    assert out.shape == (B, S, d_model)
    assert jnp.allclose(out.astype(jnp.float32), ref, atol=3e-2, rtol=3e-2)

    # --- Test 3: bf16 aligned shapes, default auto-planned (resident) path ------
    B, S, d_model, d_ff = 2, 64, 128, 256
    k1, k2, key = jax.random.split(key, 3)
    x = jax.random.normal(k1, (B, S, d_model)).astype(jnp.bfloat16)
    w1, b1, w2, b2 = make_params(k2, d_model, d_ff, jnp.bfloat16)
    out = jax.block_until_ready(positionwise_ffn(x, w1, b1, w2, b2))
    ref = reference(x, w1, b1, w2, b2)
    assert out.shape == (B, S, d_model)
    assert jnp.allclose(out.astype(jnp.float32), ref, atol=3e-2, rtol=3e-2)

    print("KERNEL_OK")
</pallas_src>

<mosaic_0001>
module attributes {stable_mosaic.version = 11 : i64} {
  func.func @_ffn_kernel_resident(%arg0: i32, %arg1: memref<8x128xf32, #tpu.memory_space<vmem>>, %arg2: memref<128x128xf32, #tpu.memory_space<vmem>>, %arg3: memref<1x128xf32, #tpu.memory_space<vmem>>, %arg4: memref<128x128xf32, #tpu.memory_space<vmem>>, %arg5: memref<1x128xf32, #tpu.memory_space<vmem>>, %arg6: memref<8x128xf32, #tpu.memory_space<vmem>>) attributes {dimension_semantics = [#tpu.dimension_semantics<parallel>], iteration_bounds = array<i64: 2>, scalar_prefetch = 0 : i64, scratch_operands = 0 : i64, tpu.core_type = #tpu.core_type<tc>, window_params = [{transform_indices = @transform_0, window_bounds = array<i64: 8, 128>}, {pipeline_mode = #tpu.pipeline_mode<synchronous>, transform_indices = @transform_1, window_bounds = array<i64: 128, 128>}, {pipeline_mode = #tpu.pipeline_mode<synchronous>, transform_indices = @transform_2, window_bounds = array<i64: 1, 128>}, {pipeline_mode = #tpu.pipeline_mode<synchronous>, transform_indices = @transform_3, window_bounds = array<i64: 128, 128>}, {pipeline_mode = #tpu.pipeline_mode<synchronous>, transform_indices = @transform_4, window_bounds = array<i64: 1, 128>}, {transform_indices = @transform_5, window_bounds = array<i64: 8, 128>}]} {
    %c0 = arith.constant 0 : index
    %c0_0 = arith.constant 0 : index
    %0 = vector.load %arg1[%c0, %c0_0] : memref<8x128xf32, #tpu.memory_space<vmem>>, vector<8x128xf32>
    %c0_1 = arith.constant 0 : index
    %c0_2 = arith.constant 0 : index
    %1 = vector.load %arg2[%c0_1, %c0_2] : memref<128x128xf32, #tpu.memory_space<vmem>>, vector<128x128xf32>
    %cst = arith.constant dense<0.000000e+00> : vector<8x128xf32>
    %2 = tpu.matmul %0, %1, %cst {dimension_numbers = #tpu.dot_dimension_numbers<[1], [0], [0], [1], [0, 0, 1, 1], [], []>} : vector<8x128xf32>, vector<128x128xf32>, vector<8x128xf32> -> vector<8x128xf32>
    %c0_3 = arith.constant 0 : index
    %c0_4 = arith.constant 0 : index
    %3 = vector.load %arg3[%c0_3, %c0_4] : memref<1x128xf32, #tpu.memory_space<vmem>>, vector<1x128xf32>
    %4 = vector.broadcast %3 : vector<1x128xf32> to vector<8x128xf32>
    %5 = arith.addf %2, %4 : vector<8x128xf32>
    %cst_5 = arith.constant 0.000000e+00 : f32
    %6 = vector.broadcast %cst_5 : f32 to vector<8x128xf32>
    %7 = arith.maximumf %5, %6 : vector<8x128xf32>
    %c0_6 = arith.constant 0 : index
    %c0_7 = arith.constant 0 : index
    %8 = vector.load %arg4[%c0_6, %c0_7] : memref<128x128xf32, #tpu.memory_space<vmem>>, vector<128x128xf32>
    %cst_8 = arith.constant dense<0.000000e+00> : vector<8x128xf32>
    %9 = tpu.matmul %7, %8, %cst_8 {dimension_numbers = #tpu.dot_dimension_numbers<[1], [0], [0], [1], [0, 0, 1, 1], [], []>} : vector<8x128xf32>, vector<128x128xf32>, vector<8x128xf32> -> vector<8x128xf32>
    %c0_9 = arith.constant 0 : index
    %c0_10 = arith.constant 0 : index
    %10 = vector.load %arg5[%c0_9, %c0_10] : memref<1x128xf32, #tpu.memory_space<vmem>>, vector<1x128xf32>
    %11 = vector.broadcast %10 : vector<1x128xf32> to vector<8x128xf32>
    %12 = arith.addf %9, %11 : vector<8x128xf32>
    %c0_11 = arith.constant 0 : index
    %c0_12 = arith.constant 0 : index
    %13 = vector.load %arg6[%c0_11, %c0_12] : memref<8x128xf32, #tpu.memory_space<vmem>>, vector<8x128xf32>
    tpu.vector_store %arg6[%c0_11, %c0_12], %12 {strides = array<i32>} : memref<8x128xf32, #tpu.memory_space<vmem>>, vector<8x128xf32>,
    return
  }
  func.func @transform_0(%arg0: i32) -> (i32, i32) {
    %c0_i32 = arith.constant 0 : i32
    %c0_i32_0 = arith.constant 0 : i32
    return %arg0, %c0_i32 : i32, i32
  }
  func.func @transform_1(%arg0: i32) -> (i32, i32) {
    %c0_i32 = arith.constant 0 : i32
    %c0_i32_0 = arith.constant 0 : i32
    %c0_i32_1 = arith.constant 0 : i32
    return %c0_i32, %c0_i32_0 : i32, i32
  }
  func.func @transform_2(%arg0: i32) -> (i32, i32) {
    %c0_i32 = arith.constant 0 : i32
    %c0_i32_0 = arith.constant 0 : i32
    %c0_i32_1 = arith.constant 0 : i32
    return %c0_i32, %c0_i32_0 : i32, i32
  }
  func.func @transform_3(%arg0: i32) -> (i32, i32) {
    %c0_i32 = arith.constant 0 : i32
    %c0_i32_0 = arith.constant 0 : i32
    %c0_i32_1 = arith.constant 0 : i32
    return %c0_i32, %c0_i32_0 : i32, i32
  }
  func.func @transform_4(%arg0: i32) -> (i32, i32) {
    %c0_i32 = arith.constant 0 : i32
    %c0_i32_0 = arith.constant 0 : i32
    %c0_i32_1 = arith.constant 0 : i32
    return %c0_i32, %c0_i32_0 : i32, i32
  }
  func.func @transform_5(%arg0: i32) -> (i32, i32) {
    %c0_i32 = arith.constant 0 : i32
    %c0_i32_0 = arith.constant 0 : i32
    return %arg0, %c0_i32 : i32, i32
  }
}

</mosaic_0001>

<bundles_post_ra>
// kernel: _ffn_impl.1
= control target key start
LH: loop header
LB: loop body
LE: loop exit
PB: predicated region body
PF: predicated region fallthrough
CT: control target
= control target key end

     0   :  { %s627_s18 = smov 0   ;;  %s791_s0 = inlined_call_operand.vmem [shape: f32[16,128], index: 0, kind: input, shape index: {}]   ;;  %s792_s1 = inlined_call_operand.vmem [shape: f32[128,128], index: 1, kind: input, shape index: {}]   ;;  %s793_s2 = inlined_call_operand.vmem [shape: f32[1,128], index: 2, kind: input, shape index: {}]   ;;  %s794_s3 = inlined_call_operand.vmem [shape: f32[128,128], index: 3, kind: input, shape index: {}]   ;;  %s795_s4 = inlined_call_operand.vmem [shape: f32[1,128], index: 4, kind: input, shape index: {}]   ;;  %s796_s5 = inlined_call_operand.vmem [shape: f32[16,128], index: 5, kind: output, shape index: {}]  }
   0x1 LB: > { %s462_s19 = sadd.s32 4294967295, %s593_s18   ;;  %p466_p0 = scmp.ge.s32.totalorder %s593_s18, 1  ;;  %s593_s18 = sphi %s627_s18, %s15_s18  }
   0x2   : > { %p186_p1 = scmp.lt.s32.totalorder %s593_s18, 3 }
   0x4   : > { %p187_p2 = pnand %p466_p0, %p186_p1 }
   0x5   : > { %p212_p3 = scmp.lt.s32.totalorder (!%p187_p2), %s462_s19, 1 }
   0x6   : > { %190 = sbr.rel (%p187_p2) target bundleno = 437 (0x1b5), region = 40 }
   0xb   : > { %v236_v0 = vld [vmem:[%s792_s1 + $0x78] sm:$0xff]  ;;  %v595_v1 = vmov 0.0   ;;  %v235_v2 = vld [vmem:[%s792_s1 + $0x70] sm:$0xff]  ;;  %vm596_vm0 = vmmov 0   ;;  %v234_v3 = vld [vmem:[%s792_s1 + $0x68] sm:$0xff]  ;;  %s798_s19 = smov (!%p212_p3, %s462_s19), 1 }
   0xc   : > { %507 = vmatprep.subr.mxu0 %v595_v1  ;;  %539 = vmatprep.mubr.msk.f32.mxu0 %vm596_vm0, %v595_v1  ;;  %v233_v4 = vld [vmem:[%s792_s1 + $0x60] sm:$0xff]  ;;  %v330_v5 = vld [vmem:[%s794_s3 + $0x78] sm:$0xff]  ;;  %v329_v6 = vld [vmem:[%s794_s3 + $0x70] sm:$0xff]  ;;  %s467_s22 = sshll.u32 %s798_s19, 3 }
   0xd   : > { %508 = vmatpush3.msra.mxu0 %v236_v0  ;;  %542 = vmatprep.subr.mxu1 %v595_v1  ;;  %v232_v7 = vld [vmem:[%s792_s1 + $0x58] sm:$0xff]  ;;  %v328_v8 = vld [vmem:[%s794_s3 + $0x68] sm:$0xff]  ;;  %v231_v9 = vld [vmem:[%s792_s1 + $0x50] sm:$0xff]  ;;  %s215_s6 = scalar_lea.vmem %s791_s0, %s467_s22  ;;  %s219_s26 = scalar_lea.vmem %s796_s5, %s467_s22 }
   0xe   : > { %509 = vmatprep.subr.mxu0 %v595_v1  ;;  %574 = vmatprep.mubr.msk.f32.mxu1 %vm596_vm0, %v595_v1  ;;  %v327_v10 = vld [vmem:[%s794_s3 + $0x60] sm:$0xff]  ;;  %v230_v11 = vld [vmem:[%s792_s1 + $0x48] sm:$0xff]  ;;  %v326_v12 = vld [vmem:[%s794_s3 + $0x58] sm:$0xff] }
   0xf   : > { %510 = vmatpush3.msra.mxu0 %v235_v2  ;;  %543 = vmatpush3.msra.mxu1 %v330_v5  ;;  %v229_v13 = vld [vmem:[%s792_s1 + $0x40] sm:$0xff]  ;;  %v325_v14 = vld [vmem:[%s794_s3 + $0x50] sm:$0xff]  ;;  %v228_v15 = vld [vmem:[%s792_s1 + $0x38] sm:$0xff] }
  0x10   : > { %511 = vmatprep.subr.mxu0 %v595_v1  ;;  %544 = vmatprep.subr.mxu1 %v595_v1  ;;  %v324_v16 = vld [vmem:[%s794_s3 + $0x48] sm:$0xff]  ;;  %v227_v17 = vld [vmem:[%s792_s1 + $0x30] sm:$0xff]  ;;  %v323_v18 = vld [vmem:[%s794_s3 + $0x40] sm:$0xff] }
  0x11   : > { %512 = vmatpush3.msra.mxu0 %v234_v3  ;;  %545 = vmatpush3.msra.mxu1 %v329_v6  ;;  %v226_v19 = vld [vmem:[%s792_s1 + $0x28] sm:$0xff]  ;;  %v322_v20 = vld [vmem:[%s794_s3 + $0x38] sm:$0xff]  ;;  %v225_v21 = vld [vmem:[%s792_s1 + $0x20] sm:$0xff] }
  0x12   : > { %513 = vmatprep.subr.mxu0 %v595_v1  ;;  %546 = vmatprep.subr.mxu1 %v595_v1  ;;  %v321_v22 = vld [vmem:[%s794_s3 + $0x30] sm:$0xff]  ;;  %v224_v23 = vld [vmem:[%s792_s1 + $0x18] sm:$0xff]  ;;  %v320_v24 = vld [vmem:[%s794_s3 + $0x28] sm:$0xff] }
  0x13   : > { %514 = vmatpush3.msra.mxu0 %v233_v4  ;;  %547 = vmatpush3.msra.mxu1 %v328_v8  ;;  %v223_v25 = vld [vmem:[%s792_s1 + $0x10] sm:$0xff]  ;;  %v319_v26 = vld [vmem:[%s794_s3 + $0x20] sm:$0xff]  ;;  %v222_v27 = vld [vmem:[%s792_s1 + $0x8] sm:$0xff] }
  0x14   : > { %515 = vmatprep.subr.mxu0 %v595_v1  ;;  %548 = vmatprep.subr.mxu1 %v595_v1  ;;  %v318_v28 = vld [vmem:[%s794_s3 + $0x18] sm:$0xff]  ;;  %v221_v29 = vld [vmem:[%s792_s1] sm:$0xff]  ;;  %v317_v31 = vld [vmem:[%s794_s3 + $0x10] sm:$0xff] }
  0x15   : > { %516 = vmatpush3.msra.mxu0 %v232_v7  ;;  %549 = vmatpush3.msra.mxu1 %v327_v10  ;;  %v220_v30 = vld [vmem:[%s215_s6] sm:$0xff]  ;;  %v316_v32 = vld [vmem:[%s794_s3 + $0x8] sm:$0xff] }
  0x16   : > { %517 = vmatprep.subr.mxu0 %v595_v1  ;;  %550 = vmatprep.subr.mxu1 %v595_v1  ;;  %v315_v33 = vld [vmem:[%s794_s3] sm:$0xff] }
  0x17   : > { %518 = vmatpush3.msra.mxu0 %v231_v9  ;;  %551 = vmatpush3.msra.mxu1 %v326_v12  ;;  %v469_v34 = vld [vmem:[%s793_s2] ss:$0 sm:$0xff] }
  0x18   : > { %519 = vmatprep.subr.mxu0 %v595_v1  ;;  %552 = vmatprep.subr.mxu1 %v595_v1  ;;  %v470_v39 = vld [vmem:[%s795_s4] ss:$0 sm:$0xff] }
  0x19   : > { %520 = vmatpush3.msra.mxu0 %v230_v11  ;;  %553 = vmatpush3.msra.mxu1 %v325_v14 }
  0x1a   : > { %521 = vmatprep.subr.mxu0 %v595_v1  ;;  %554 = vmatprep.subr.mxu1 %v595_v1 }
  0x1b   : > { %522 = vmatpush3.msra.mxu0 %v229_v13  ;;  %555 = vmatpush3.msra.mxu1 %v324_v16 }
  0x1c   : > { %523 = vmatprep.subr.mxu0 %v595_v1  ;;  %556 = vmatprep.subr.mxu1 %v595_v1 }
  0x1d   : > { %524 = vmatpush3.msra.mxu0 %v228_v15  ;;  %557 = vmatpush3.msra.mxu1 %v323_v18 }
  0x1e   : > { %525 = vmatprep.subr.mxu0 %v595_v1  ;;  %558 = vmatprep.subr.mxu1 %v595_v1 }
  0x1f   : > { %526 = vmatpush3.msra.mxu0 %v227_v17  ;;  %559 = vmatpush3.msra.mxu1 %v322_v20 }
  0x20   : > { %527 = vmatprep.subr.mxu0 %v595_v1  ;;  %560 = vmatprep.subr.mxu1 %v595_v1 }
  0x21   : > { %528 = vmatpush3.msra.mxu0 %v226_v19  ;;  %561 = vmatpush3.msra.mxu1 %v321_v22 }
  0x22   : > { %529 = vmatprep.subr.mxu0 %v595_v1  ;;  %562 = vmatprep.subr.mxu1 %v595_v1 }
  0x23   : > { %530 = vmatpush3.msra.mxu0 %v225_v21  ;;  %563 = vmatpush3.msra.mxu1 %v320_v24 }
  0x24   : > { %531 = vmatprep.subr.mxu0 %v595_v1  ;;  %564 = vmatprep.subr.mxu1 %v595_v1 }
  0x25   : > { %532 = vmatpush3.msra.mxu0 %v224_v23  ;;  %565 = vmatpush3.msra.mxu1 %v319_v26 }
  0x26   : > { %533 = vmatprep.subr.mxu0 %v595_v1  ;;  %566 = vmatprep.subr.mxu1 %v595_v1 }
  0x27   : > { %534 = vmatpush3.msra.mxu0 %v223_v25  ;;  %567 = vmatpush3.msra.mxu1 %v318_v28 }
  0x28   : > { %535 = vmatprep.subr.mxu0 %v595_v1  ;;  %568 = vmatprep.subr.mxu1 %v595_v1 }
  0x29   : > { %536 = vmatpush3.msra.mxu0 %v222_v27  ;;  %569 = vmatpush3.msra.mxu1 %v317_v31 }
  0x2a   : > { %537 = vmatprep.subr.mxu0 %v595_v1  ;;  %570 = vmatprep.subr.mxu1 %v595_v1 }
  0x2b   : > { %538 = vmatpush3.msra.mxu0 %v221_v29  ;;  %571 = vmatpush3.msra.mxu1 %v316_v32 }
  0x2c   : > { %540 = vmatmul.mubr.f32.vlgmr.msra.gmra.mxu0 %v220_v30  ;;  %572 = vmatprep.subr.mxu1 %v595_v1 }
  0x2d   : > { %573 = vmatpush3.msra.mxu1 %v315_v33 }
  0xec   : > { %v310_v35 = vpop.f32.mrf.mxu0 }
  0xed   : > { %v311_v36 = vadd.f32 %v469_v34, %v310_v35 }
  0xee   : > { %v541_v37 = vpop.f32.mrf.mxu0 }
  0xef   : > { %v314_v38 = vmax.f32 %v311_v36, 0.0 }
  0xf1   : > { %575 = vmatmul.mubr.f32.vlgmr.msra.gmra.mxu1 %v314_v38 }
 0x1b1   : > { %v404_v40 = vpop.f32.mrf.mxu1 }
 0x1b2   : > { %v405_v41 = vadd.f32 %v470_v39, %v404_v40 }
 0x1b3   : > { %v576_v42 = vpop.f32.mrf.mxu1 }
 0x1b4   : > { %408 = vst [vmem:[%s219_s26] sm:$0xff] %v405_v41 }
 0x1b5 PF: > { %s15_s18 = sadd.s32 1, %s593_s18  }
 0x1b6   : > { %p12_p4 = scmp.ge.s32.totalorder %s15_s18, 4  }
 0x1b8   :  { %14 = sbr.rel (!%p12_p4) target bundleno = 1 (0x1), region = 70 }

</bundles_post_ra>
